<compile_context>
chip_gen: v6e
topology: v6e:2x2x1
jax: 0.10.0
libtpu: 0.0.40
codegen_flags: <defaults>
</compile_context>

<pallas_src>
import jax
import jax.numpy as jnp
from jax import lax
from jax.experimental import pallas as pl
from jax.experimental.pallas import tpu as pltpu


def _round_up(n, m):
    return ((n + m - 1) // m) * m


def _classifier_kernel(x_ref, w_ref, b_ref, o_ref):
    # x_ref: (TB, D)   w_ref: (C_pad, D)   b_ref: (1, C_pad)   o_ref: (TB, C_pad)
    x = x_ref[...]
    w = w_ref[...]

    # Linear: contract last dim of x against last dim of w -> (TB, C_pad).
    # Feeds the MXU directly (no transpose); f32 accumulation.
    logits = lax.dot_general(
        x, w,
        dimension_numbers=(((1,), (1,)), ((), ())),
        preferred_element_type=jnp.float32,
    ) + b_ref[...].astype(jnp.float32)

    # Numerically-stable log-softmax over the (lane-dense) class axis.
    # Padded lanes carry bias=-inf -> exp()==0, so they do not perturb the sum.
    m = jnp.max(logits, axis=-1, keepdims=True)
    shifted = logits - m
    lse = jnp.log(jnp.sum(jnp.exp(shifted), axis=-1, keepdims=True))
    o_ref[...] = (shifted - lse).astype(o_ref.dtype)


def classifier_forward(x, weight, bias, *, max_rows_per_tile=512):
    """x: (B, D), weight: (C, D), bias: (C,) -> log_softmax(x @ W^T + b), shape (B, C)."""
    B, D = x.shape
    C, D2 = weight.shape
    assert D == D2 and bias.shape == (C,)

    # --- lane-dense class dimension: pad C up to a multiple of 128 ---------
    C_pad = _round_up(max(C, 128), 128)
    if C_pad != C:
        weight_p = jnp.zeros((C_pad, D), weight.dtype).at[:C].set(weight)
        bias_p = (jnp.full((C_pad,), -jnp.inf, jnp.float32)
                  .at[:C].set(bias.astype(jnp.float32)))
    else:
        weight_p = weight
        bias_p = bias.astype(jnp.float32)
    bias2d = bias_p.reshape(1, C_pad)

    # --- batch tiling: pipelined x/out tiles, "parallel" grid axis ---------
    TB = min(max_rows_per_tile, _round_up(B, 8))
    B_pad = _round_up(B, TB)
    if B_pad != B:
        x_p = jnp.zeros((B_pad, D), x.dtype).at[:B].set(x)
    else:
        x_p = x

    grid = (B_pad // TB,)

    cost = pl.CostEstimate(
        flops=2 * B_pad * D * C_pad,
        transcendentals=B_pad * C_pad,
        bytes_accessed=(x_p.size * x_p.dtype.itemsize
                        + weight_p.size * weight_p.dtype.itemsize
                        + bias2d.size * bias2d.dtype.itemsize
                        + B_pad * C_pad * 4),
    )

    out_padded = pl.pallas_call(
        _classifier_kernel,
        out_shape=jax.ShapeDtypeStruct((B_pad, C_pad), jnp.float32),
        grid_spec=pl.GridSpec(
            grid=grid,
            in_specs=[
                pl.BlockSpec((TB, D), lambda i: (i, 0)),      # x tile (pipelined)
                pl.BlockSpec((C_pad, D), lambda i: (0, 0)),   # weight (resident)
                pl.BlockSpec((1, C_pad), lambda i: (0, 0)),   # bias (resident)
            ],
            out_specs=pl.BlockSpec((TB, C_pad), lambda i: (i, 0)),
        ),
        compiler_params=pltpu.CompilerParams(
            dimension_semantics=("parallel",),
        ),
        cost_estimate=cost,
    )(x_p, weight_p, bias2d)

    return out_padded[:B, :C]


if __name__ == "__main__":
    key = jax.random.PRNGKey(0)
    batch, mem_dim, num_classes = 8, 32, 5

    kx, kw, kb = jax.random.split(key, 3)
    x = jax.random.normal(kx, (batch, mem_dim), dtype=jnp.float32)
    # Deterministic init mimicking nn.Linear's uniform(-1/sqrt(D), 1/sqrt(D))
    bound = 1.0 / jnp.sqrt(jnp.float32(mem_dim))
    weight = jax.random.uniform(kw, (num_classes, mem_dim), jnp.float32, -bound, bound)
    bias = jax.random.uniform(kb, (num_classes,), jnp.float32, -bound, bound)

    out = classifier_forward(x, weight, bias)
    jax.block_until_ready(out)

    # Reference check in plain JAX
    ref = jax.nn.log_softmax(x @ weight.T + bias, axis=-1)
    assert out.shape == (batch, num_classes)
    assert jnp.allclose(out, ref, atol=1e-5, rtol=1e-5), "mismatch vs reference"

    print("KERNEL_OK")
</pallas_src>

<mosaic_0001>
module attributes {stable_mosaic.version = 11 : i64} {
  func.func @_classifier_kernel(%arg0: i32, %arg1: memref<8x32xf32, #tpu.memory_space<vmem>>, %arg2: memref<128x32xf32, #tpu.memory_space<vmem>>, %arg3: memref<1x128xf32, #tpu.memory_space<vmem>>, %arg4: memref<8x128xf32, #tpu.memory_space<vmem>>) attributes {dimension_semantics = [#tpu.dimension_semantics<parallel>], iteration_bounds = array<i64: 1>, scalar_prefetch = 0 : i64, scratch_operands = 0 : i64, tpu.core_type = #tpu.core_type<tc>, window_params = [{transform_indices = @transform_0, window_bounds = array<i64: 8, 32>}, {pipeline_mode = #tpu.pipeline_mode<synchronous>, transform_indices = @transform_1, window_bounds = array<i64: 128, 32>}, {pipeline_mode = #tpu.pipeline_mode<synchronous>, transform_indices = @transform_2, window_bounds = array<i64: 1, 128>}, {transform_indices = @transform_3, window_bounds = array<i64: 8, 128>}]} {
    %c0 = arith.constant 0 : index
    %c0_0 = arith.constant 0 : index
    %0 = vector.load %arg1[%c0, %c0_0] : memref<8x32xf32, #tpu.memory_space<vmem>>, vector<8x32xf32>
    %c0_1 = arith.constant 0 : index
    %c0_2 = arith.constant 0 : index
    %1 = vector.load %arg2[%c0_1, %c0_2] : memref<128x32xf32, #tpu.memory_space<vmem>>, vector<128x32xf32>
    %cst = arith.constant dense<0.000000e+00> : vector<8x128xf32>
    %2 = tpu.matmul %0, %1, %cst {dimension_numbers = #tpu.dot_dimension_numbers<[1], [1], [0], [0], [0, 0, 1, 0], [], []>} : vector<8x32xf32>, vector<128x32xf32>, vector<8x128xf32> -> vector<8x128xf32>
    %c0_3 = arith.constant 0 : index
    %c0_4 = arith.constant 0 : index
    %3 = vector.load %arg3[%c0_3, %c0_4] : memref<1x128xf32, #tpu.memory_space<vmem>>, vector<1x128xf32>
    %4 = vector.broadcast %3 : vector<1x128xf32> to vector<8x128xf32>
    %5 = arith.addf %2, %4 : vector<8x128xf32>
    %cst_5 = arith.constant dense<0xFF800000> : vector<8xf32>
    %6 = vector.multi_reduction <maximumf>, %5, %cst_5 [1] : vector<8x128xf32> to vector<8xf32>
    %7 = vector.shape_cast %6 : vector<8xf32> to vector<8x1xf32>
    %8 = vector.broadcast %7 : vector<8x1xf32> to vector<8x128xf32>
    %9 = arith.subf %5, %8 : vector<8x128xf32>
    %10 = math.exp %9 : vector<8x128xf32>
    %cst_6 = arith.constant dense<0.000000e+00> : vector<8xf32>
    %11 = vector.multi_reduction <add>, %10, %cst_6 [1] : vector<8x128xf32> to vector<8xf32>
    %12 = vector.shape_cast %11 : vector<8xf32> to vector<8x1xf32>
    %13 = math.log %12 : vector<8x1xf32>
    %14 = vector.broadcast %13 : vector<8x1xf32> to vector<8x128xf32>
    %15 = arith.subf %9, %14 : vector<8x128xf32>
    %c0_7 = arith.constant 0 : index
    %c0_8 = arith.constant 0 : index
    %16 = vector.load %arg4[%c0_7, %c0_8] : memref<8x128xf32, #tpu.memory_space<vmem>>, vector<8x128xf32>
    tpu.vector_store %arg4[%c0_7, %c0_8], %15 {strides = array<i32>} : memref<8x128xf32, #tpu.memory_space<vmem>>, vector<8x128xf32>,
    return
  }
  func.func @transform_0(%arg0: i32) -> (i32, i32) {
    %c0_i32 = arith.constant 0 : i32
    %c0_i32_0 = arith.constant 0 : i32
    return %arg0, %c0_i32 : i32, i32
  }
  func.func @transform_1(%arg0: i32) -> (i32, i32) {
    %c0_i32 = arith.constant 0 : i32
    %c0_i32_0 = arith.constant 0 : i32
    %c0_i32_1 = arith.constant 0 : i32
    return %c0_i32, %c0_i32_0 : i32, i32
  }
  func.func @transform_2(%arg0: i32) -> (i32, i32) {
    %c0_i32 = arith.constant 0 : i32
    %c0_i32_0 = arith.constant 0 : i32
    %c0_i32_1 = arith.constant 0 : i32
    return %c0_i32, %c0_i32_0 : i32, i32
  }
  func.func @transform_3(%arg0: i32) -> (i32, i32) {
    %c0_i32 = arith.constant 0 : i32
    %c0_i32_0 = arith.constant 0 : i32
    return %arg0, %c0_i32 : i32, i32
  }
}

</mosaic_0001>

<bundles_post_ra>
// kernel: tpu_custom_call.1
= control target key start
LH: loop header
LB: loop body
LE: loop exit
PB: predicated region body
PF: predicated region fallthrough
CT: control target
= control target key end

     0   :  { %vm39_vm0 = vcmask 261120   ;;  %v285_v1 = vmov 0.0   ;;  %vm286_vm1 = vmmov 0   ;;  %s382_s0 = inlined_call_operand.vmem [shape: f32[8,32], index: 0, kind: input, shape index: {}]   ;;  %s383_s1 = inlined_call_operand.vmem [shape: f32[128,32], index: 1, kind: input, shape index: {}]   ;;  %s384_s2 = inlined_call_operand.vmem [shape: f32[1,128], index: 2, kind: input, shape index: {}]   ;;  %s385_s3 = inlined_call_operand.hbm [shape: f32[8,128], index: 3, kind: output, shape index: {}]  }
   0x1   :  { %v31_v0 = vld [vmem:[%s383_s1 + $0x78] sm:$0xff]  ;;  %221 = vmatprep.subr.mxu0 %v285_v1  ;;  %253 = vmatprep.mubr.msk.f32.mxu0 %vm286_vm1, %v285_v1  ;;  %v30_v2 = vld [vmem:[%s383_s1 + $0x70] sm:$0xff] }
   0x2   :  { %222 = vmatpush3.xpose.msk.msra.mxu0 %vm39_vm0, %v31_v0 }
   0x3   :  { %223 = vmatprep.subr.mxu0 %v285_v1 }
   0x6   :  { %224 = vmatpush3.xpose.msk.msra.mxu0 %vm39_vm0, %v30_v2 }
   0x7   :  { %8 = vsyncpa [#allocation3], 0  ;;  %225 = vmatprep.subr.mxu0 %v285_v1  ;;  %v29_v3 = vld [vmem:[%s383_s1 + $0x68] sm:$0xff]  ;;  %v28_v4 = vld [vmem:[%s383_s1 + $0x60] sm:$0xff] }
   0x8   :  { %v27_v5 = vld [vmem:[%s383_s1 + $0x58] sm:$0xff]  ;;  %v26_v6 = vld [vmem:[%s383_s1 + $0x50] sm:$0xff]  ;;  %v25_v7 = vld [vmem:[%s383_s1 + $0x48] sm:$0xff] }
   0x9   :  { %v24_v8 = vld [vmem:[%s383_s1 + $0x40] sm:$0xff]  ;;  %v23_v9 = vld [vmem:[%s383_s1 + $0x38] sm:$0xff]  ;;  %v22_v10 = vld [vmem:[%s383_s1 + $0x30] sm:$0xff] }
   0xa   :  { %226 = vmatpush3.xpose.msk.msra.mxu0 %vm39_vm0, %v29_v3  ;;  %v21_v11 = vld [vmem:[%s383_s1 + $0x28] sm:$0xff]  ;;  %v20_v12 = vld [vmem:[%s383_s1 + $0x20] sm:$0xff]  ;;  %v19_v13 = vld [vmem:[%s383_s1 + $0x18] sm:$0xff] }
   0xb   :  { %227 = vmatprep.subr.mxu0 %v285_v1  ;;  %v18_v14 = vld [vmem:[%s383_s1 + $0x10] sm:$0xff]  ;;  %v17_v15 = vld [vmem:[%s383_s1 + $0x8] sm:$0xff]  ;;  %v16_v16 = vld [vmem:[%s383_s1] sm:$0xff] }
   0xc   :  { %v15_v17 = vld [vmem:[%s382_s0] sm:$0xff]  ;;  %s287_s0 = smov [#allocation2]  }
   0xd   :  { %v186_v18 = vld [vmem:[%s384_s2] ss:$0 sm:$0xff]  ;;  %s178_s1 = sshll.u32 %s287_s0, 4  ;;  %s179_s1 = int_to_ptr.vmem [resolvable:$true] %s178_s1 }
   0xe   :  { %228 = vmatpush3.xpose.msk.msra.mxu0 %vm39_vm0, %v28_v4  ;;  %s263_s2 = scalar_lea.vmem %s179_s1, 128  ;;  %p268_p1 = scmp.lt.s32.totalorder %s179_s1, %s179_s1 }
   0xf   :  { %229 = vmatprep.subr.mxu0 %v285_v1  ;;  %p264_p0 = scmp.ne.s32.totalorder %s179_s1, %s263_s2  ;;  %p269_p2 = scmp.lt.s32.totalorder %s263_s2, %s263_s2 }
  0x11   :  { %p270_p3 = por %p269_p2, %p268_p1 }
  0x12   :  { %230 = vmatpush3.xpose.msk.msra.mxu0 %vm39_vm0, %v27_v5 }
  0x13   :  { %231 = vmatprep.subr.mxu0 %v285_v1  ;;  %p271_p4 = pnand %p270_p3, %p264_p0 }
  0x16   :  { %232 = vmatpush3.xpose.msk.msra.mxu0 %vm39_vm0, %v26_v6 }
  0x17   :  { %233 = vmatprep.subr.mxu0 %v285_v1 }
  0x1a   :  { %234 = vmatpush3.xpose.msk.msra.mxu0 %vm39_vm0, %v25_v7 }
  0x1b   :  { %235 = vmatprep.subr.mxu0 %v285_v1 }
  0x1e   :  { %236 = vmatpush3.xpose.msk.msra.mxu0 %vm39_vm0, %v24_v8 }
  0x1f   :  { %237 = vmatprep.subr.mxu0 %v285_v1 }
  0x22   :  { %238 = vmatpush3.xpose.msk.msra.mxu0 %vm39_vm0, %v23_v9 }
  0x23   :  { %239 = vmatprep.subr.mxu0 %v285_v1 }
  0x26   :  { %240 = vmatpush3.xpose.msk.msra.mxu0 %vm39_vm0, %v22_v10 }
  0x27   :  { %241 = vmatprep.subr.mxu0 %v285_v1 }
  0x2a   :  { %242 = vmatpush3.xpose.msk.msra.mxu0 %vm39_vm0, %v21_v11 }
  0x2b   :  { %243 = vmatprep.subr.mxu0 %v285_v1 }
  0x2e   :  { %244 = vmatpush3.xpose.msk.msra.mxu0 %vm39_vm0, %v20_v12 }
  0x2f   :  { %245 = vmatprep.subr.mxu0 %v285_v1 }
  0x32   :  { %246 = vmatpush3.xpose.msk.msra.mxu0 %vm39_vm0, %v19_v13 }
  0x33   :  { %247 = vmatprep.subr.mxu0 %v285_v1 }
  0x36   :  { %248 = vmatpush3.xpose.msk.msra.mxu0 %vm39_vm0, %v18_v14 }
  0x37   :  { %249 = vmatprep.subr.mxu0 %v285_v1 }
  0x3a   :  { %250 = vmatpush3.xpose.msk.msra.mxu0 %vm39_vm0, %v17_v15 }
  0x3b   :  { %251 = vmatprep.subr.mxu0 %v285_v1 }
  0x3e   :  { %252 = vmatpush3.xpose.msk.msra.mxu0 %vm39_vm0, %v16_v16 }
  0x41   :  { %254 = vmatmul.mubr.msk.f32.vlgmr.msra.gmra.mxu0 %vm39_vm0, %v15_v17 }
 0x101   :  { %v157_v19 = vpop.f32.mrf.mxu0 }
 0x102   :  { %v158_v20 = vadd.f32 %v186_v18, %v157_v19 }
 0x103   :  { %v255_v21 = vpop.f32.mrf.mxu0 }
 0x104   :  { %161 = vmax.xlane.f32.xlu0 %v158_v20 }
 0x18d   :  { %v162_v22 = vpop.xlane.xlu0 %161 }
 0x18e   :  { %v163_v23 = vsub.f32 %v158_v20, %v162_v22 }
 0x190   :  { %v164_v24 = vmul.f32 1.442695, %v163_v23 }
 0x192   :  { %259 = vpow2.f32 %v164_v24 }
 0x19f   :  { %v260_v25 = vpop.eup %259 }
 0x1a0   :  { %166 = vadd.xlane.f32.xlu0 %v260_v25 }
 0x229   :  { %v167_v26 = vpop.xlane.xlu0 %166 }
 0x22a   :  { %261 = vlog2.f32 %v167_v26 }
 0x237   :  { %v262_v27 = vpop.eup %261 }
 0x238   :  { %v169_v28 = vmul.f32 0.6931472, %v262_v27 }
 0x23a   :  { %v170_v29 = vsub.f32 %v163_v23, %v169_v28 }
 0x23c   :  { %171 = vst [vmem:[#allocation2] sm:$0xff] %v170_v29 }
 0x23d   :  { %274 = shalt.err (!%p271_p4)
}
 0x23e   :  { %181 = dma.vmem_to_hbm [thread:$0]  %s179_s1, 128, %s385_s3, [#allocation3]  }
 0x23f   :  { %283 = dma.done.wait [#allocation3], 128  }
 0x240   :  { %284 = vsyncadd [#allocation3], 4294967168 }
 0x241   :  { %185 = vsyncpa [#allocation3], 1 }

</bundles_post_ra>
